<compile_context>
chip_gen: v7x
topology: tpu7x:2x2x1
jax: 0.10.0
libtpu: 0.0.40
codegen_flags: <defaults>
</compile_context>

<pallas_src>
import jax
import jax.numpy as jnp
from jax.experimental import pallas as pl
from jax.experimental.pallas import tpu as pltpu

KH = KW = 3          # kernel_size
STRIDE = 1           # default stride of the module
EPS = 1e-5           # nn.BatchNorm2d default eps
LANES = 128          # TPU lane width


# --------------------------------------------------------------------------
# Pass 1: single-dot conv (bf16 MXU, f32 acc) + per-tile (mean, M2) partials
# --------------------------------------------------------------------------
def conv_stats_kernel(x_ref, w_ref, mean_ref, m2_ref):
    """x_ref: (K, TW) bf16 im2col'd tile; w_ref: (Coutp, K) bf16.

    Emits per-tile per-channel mean and sum-of-squared-deviations (Welford
    partials) -- only (Coutp, 1) f32 each goes back to HBM.
    """
    acc = jnp.dot(w_ref[...], x_ref[...],
                  preferred_element_type=jnp.float32)          # (Coutp, TW)
    tw = acc.shape[1]
    m = jnp.sum(acc, axis=1, keepdims=True) * (1.0 / tw)       # (Coutp, 1)
    d = acc - m
    mean_ref[...] = m
    m2_ref[...] = jnp.sum(d * d, axis=1, keepdims=True)


# --------------------------------------------------------------------------
# Pass 2: recompute conv, apply folded BN affine + ReLU, channel-major store
# --------------------------------------------------------------------------
def conv_bn_relu_kernel(x_ref, w_ref, scale_ref, shift_ref, o_ref):
    acc = jnp.dot(w_ref[...], x_ref[...],
                  preferred_element_type=jnp.float32)          # (Coutp, TW)
    y = jnp.maximum(acc * scale_ref[...] + shift_ref[...], 0.0)
    # Slice away the MXU channel padding BEFORE the store: only the real Cout
    # channels hit HBM, lane dim TW stays 128-aligned -> unmasked vst.
    o_ref[...] = y[:o_ref.shape[0], :].astype(o_ref.dtype)


# --------------------------------------------------------------------------
# Tiling helpers
# --------------------------------------------------------------------------
def _pick_row_tile(H, W, max_rows=4096):
    """Largest divisor TH of H with TH*W <= max_rows and a 128-aligned lane
    dim (unless the tile is the whole image)."""
    if H * W <= max_rows:
        return H
    fallback = None
    for th in range(H, 0, -1):
        if H % th:
            continue
        if (H // th) > 1 and (th * W) % 128 != 0:
            continue
        if th * W <= max_rows:
            return th
        fallback = th
    return fallback if fallback is not None else H


def _vmem_limit(block_bytes):
    # Double-buffered blocks + headroom for the f32 accumulator / compiler
    # scratch.  Stays well inside v7x's 32 MiB scoped / 64 MiB physical VMEM.
    need = 2 * block_bytes + (8 << 20)
    return int(min(max(need, 16 << 20), 48 << 20))


@jax.jit
def conv_bn_relu(x_nchw, w_oihw, conv_bias, gamma, beta):
    """NCHW in / NCHW out, matching the PyTorch module's forward."""
    del conv_bias  # exactly cancelled by the train-mode BN mean subtraction
    N, Cin, H, W = x_nchw.shape
    Cout = w_oihw.shape[0]
    pad = KH // 2
    KK = KH * KW * Cin
    TH = _pick_row_tile(H, W)
    GH = H // TH
    TW = TH * W
    G = N * GH
    Coutp = ((Cout + LANES - 1) // LANES) * LANES   # MXU-operand pad only

    # ---- XLA glue (fused under this jit): lane-dense im2col of the bf16 x ----
    xb = x_nchw.astype(jnp.bfloat16)
    xp = jnp.pad(xb, ((0, 0), (0, 0), (pad, pad), (pad, pad)))
    taps = [xp[:, :, kh:kh + H, kw:kw + W]
            for kh in range(KH) for kw in range(KW)]           # each (N,Cin,H,W)
    xi = jnp.stack(taps, axis=1).reshape(N, KK, GH, TH, W)     # tap-major, Cin minor
    xi = jnp.transpose(xi, (0, 2, 1, 3, 4)).reshape(N, GH, KK, TW)

    # Weights: (Cout,Cin,KH,KW) -> (Coutp, KH*KW*Cin), same K ordering as xi.
    w2 = jnp.transpose(w_oihw, (0, 2, 3, 1)).reshape(Cout, KK)
    w2 = jnp.pad(w2, ((0, Coutp - Cout), (0, 0))).astype(jnp.bfloat16)

    x_block_bytes = KK * TW * 2
    w_bytes = Coutp * KK * 2
    acc_bytes = Coutp * TW * 4
    mm_flops = 2 * G * Coutp * KK * TW

    # ---------------------- pass 1: conv + per-tile stats ---------------------
    bytes1 = G * x_block_bytes + w_bytes + 2 * G * Coutp * 4
    tile_mean, tile_m2 = pl.pallas_call(
        conv_stats_kernel,
        out_shape=(
            jax.ShapeDtypeStruct((N, GH, Coutp, 1), jnp.float32),
            jax.ShapeDtypeStruct((N, GH, Coutp, 1), jnp.float32),
        ),
        grid=(N, GH),
        in_specs=[
            pl.BlockSpec((None, None, KK, TW), lambda n, g: (n, g, 0, 0)),
            pl.BlockSpec((Coutp, KK), lambda n, g: (0, 0)),
        ],
        out_specs=(
            pl.BlockSpec((None, None, Coutp, 1), lambda n, g: (n, g, 0, 0)),
            pl.BlockSpec((None, None, Coutp, 1), lambda n, g: (n, g, 0, 0)),
        ),
        compiler_params=pltpu.CompilerParams(
            dimension_semantics=("parallel", "parallel"),
            vmem_limit_bytes=_vmem_limit(x_block_bytes + w_bytes + acc_bytes)),
        cost_estimate=pl.CostEstimate(
            flops=mm_flops + 4 * G * Coutp * TW, transcendentals=0,
            bytes_accessed=bytes1),
    )(xi, w2)

    # ---- tiny per-channel Welford combine + BN affine fold (XLA, O(G*C)) ----
    tm = tile_mean[..., 0].reshape(G, Coutp)                   # (G, Coutp)
    t2 = tile_m2[..., 0].reshape(G, Coutp)
    mean = jnp.mean(tm, axis=0)                                # (Coutp,)
    m2 = jnp.sum(t2, axis=0) + TW * jnp.sum((tm - mean) ** 2, axis=0)
    var = m2 / float(G * TW)                                   # biased (N,H,W) var
    inv_std = jax.lax.rsqrt(var + EPS)
    gamma_p = jnp.pad(gamma.astype(jnp.float32), (0, Coutp - Cout))
    beta_p = jnp.pad(beta.astype(jnp.float32), (0, Coutp - Cout))
    scale = (gamma_p * inv_std).reshape(Coutp, 1)
    shift = (beta_p - mean * gamma_p * inv_std).reshape(Coutp, 1)

    # ----------- pass 2: conv recompute + scale/shift + ReLU + store ----------
    out_block_bytes = Cout * TW * 4
    bytes2 = (G * x_block_bytes + w_bytes + 2 * Coutp * 4
              + N * Cout * H * W * 4)
    out = pl.pallas_call(
        conv_bn_relu_kernel,
        out_shape=jax.ShapeDtypeStruct((N, Cout, H * W), jnp.float32),
        grid=(N, GH),
        in_specs=[
            pl.BlockSpec((None, None, KK, TW), lambda n, g: (n, g, 0, 0)),
            pl.BlockSpec((Coutp, KK), lambda n, g: (0, 0)),
            pl.BlockSpec((Coutp, 1), lambda n, g: (0, 0)),
            pl.BlockSpec((Coutp, 1), lambda n, g: (0, 0)),
        ],
        out_specs=pl.BlockSpec((None, Cout, TW), lambda n, g: (n, 0, g)),
        compiler_params=pltpu.CompilerParams(
            dimension_semantics=("parallel", "parallel"),
            vmem_limit_bytes=_vmem_limit(x_block_bytes + w_bytes
                                         + out_block_bytes + acc_bytes)),
        cost_estimate=pl.CostEstimate(
            flops=mm_flops + 3 * G * Coutp * TW, transcendentals=0,
            bytes_accessed=bytes2),
    )(xi, w2, scale, shift)

    # Blocks were written channel-major into (N, Cout, H*W): this reshape is
    # a free bitcast, no epilogue transpose / slice pass over HBM.
    return out.reshape(N, Cout, H, W)


# --------------------------------------------------------------------------
# Pure-JAX f32 reference (includes the conv bias: it cancels under train-mode
# BN, confirming the in-kernel bias drop is exact up to bf16 rounding).
# --------------------------------------------------------------------------
def _reference(x, w, b, gamma, beta):
    out = jax.lax.conv_general_dilated(
        x, w, window_strides=(STRIDE, STRIDE), padding="SAME",
        dimension_numbers=("NCHW", "OIHW", "NCHW"),
        precision=jax.lax.Precision.HIGHEST)
    out = out + b.reshape(1, -1, 1, 1)
    mean = out.mean(axis=(0, 2, 3), keepdims=True)
    var = ((out - mean) ** 2).mean(axis=(0, 2, 3), keepdims=True)
    out = (out - mean) * jax.lax.rsqrt(var + EPS)
    out = out * gamma.reshape(1, -1, 1, 1) + beta.reshape(1, -1, 1, 1)
    return jnp.maximum(out, 0.0)


if __name__ == "__main__":
    # Small deterministic example consistent with the module:
    # in_feat=4, out_feat=8, kernel_size=3, stride=1, batch=2, spatial=16.
    key = jax.random.PRNGKey(0)
    k_x, k_w, k_b, k_g, k_be = jax.random.split(key, 5)

    N, Cin, H, W = 2, 4, 16, 16
    Cout = 8

    x = jax.random.normal(k_x, (N, Cin, H, W), dtype=jnp.float32)
    w = 0.1 * jax.random.normal(k_w, (Cout, Cin, KH, KW), dtype=jnp.float32)
    conv_bias = 0.1 * jax.random.normal(k_b, (Cout,), dtype=jnp.float32)
    gamma = 1.0 + 0.1 * jax.random.normal(k_g, (Cout,), dtype=jnp.float32)
    beta = 0.1 * jax.random.normal(k_be, (Cout,), dtype=jnp.float32)

    y = conv_bn_relu(x, w, conv_bias, gamma, beta)
    jax.block_until_ready(y)
    assert y.shape == (N, Cout, H, W), y.shape

    # Correctness check vs. the f32 reference (bf16 matmul -> loose tolerance).
    y_ref = _reference(x, w, conv_bias, gamma, beta)
    err = float(jnp.max(jnp.abs(y - y_ref)))
    assert err < 1e-1, f"max abs error {err}"

    print("KERNEL_OK")
</pallas_src>

<mosaic_0001>
module attributes {stable_mosaic.version = 11 : i64} {
  func.func @conv_stats_kernel(%arg0: i32, %arg1: i32, %arg2: memref<1x1x36x256xbf16, #tpu.memory_space<vmem>>, %arg3: memref<128x36xbf16, #tpu.memory_space<vmem>>, %arg4: memref<1x1x128x1xf32, #tpu.memory_space<vmem>>, %arg5: memref<1x1x128x1xf32, #tpu.memory_space<vmem>>) attributes {dimension_semantics = [#tpu.dimension_semantics<parallel>, #tpu.dimension_semantics<parallel>], iteration_bounds = array<i64: 2, 1>, scalar_prefetch = 0 : i64, scratch_operands = 0 : i64, tpu.core_type = #tpu.core_type<tc>, window_params = [{transform_indices = @transform_0, window_bounds = array<i64: 1, 1, 36, 256>}, {pipeline_mode = #tpu.pipeline_mode<synchronous>, transform_indices = @transform_1, window_bounds = array<i64: 128, 36>}, {transform_indices = @transform_2, window_bounds = array<i64: 1, 1, 128, 1>}, {transform_indices = @transform_3, window_bounds = array<i64: 1, 1, 128, 1>}]} {
    %c0 = arith.constant 0 : index
    %c0_0 = arith.constant 0 : index
    %0 = vector.load %arg3[%c0, %c0_0] : memref<128x36xbf16, #tpu.memory_space<vmem>>, vector<128x36xbf16>
    %c0_1 = arith.constant 0 : index
    %c0_2 = arith.constant 0 : index
    %c0_3 = arith.constant 0 : index
    %c0_4 = arith.constant 0 : index
    %1 = vector.load %arg2[%c0_1, %c0_2, %c0_3, %c0_4] : memref<1x1x36x256xbf16, #tpu.memory_space<vmem>>, vector<1x1x36x256xbf16>
    %2 = vector.shape_cast %1 : vector<1x1x36x256xbf16> to vector<36x256xbf16>
    %cst = arith.constant dense<0.000000e+00> : vector<128x256xf32>
    %3 = tpu.matmul %0, %2, %cst {dimension_numbers = #tpu.dot_dimension_numbers<[1], [0], [0], [1], [0, 0, 1, 1], [], []>} : vector<128x36xbf16>, vector<36x256xbf16>, vector<128x256xf32> -> vector<128x256xf32>
    %cst_5 = arith.constant dense<0.000000e+00> : vector<128xf32>
    %4 = vector.multi_reduction <add>, %3, %cst_5 [1] : vector<128x256xf32> to vector<128xf32>
    %5 = vector.shape_cast %4 : vector<128xf32> to vector<128x1xf32>
    %cst_6 = arith.constant 3.906250e-03 : f32
    %6 = vector.broadcast %cst_6 : f32 to vector<128x1xf32>
    %7 = arith.mulf %5, %6 : vector<128x1xf32>
    %8 = vector.broadcast %7 : vector<128x1xf32> to vector<128x256xf32>
    %9 = arith.subf %3, %8 : vector<128x256xf32>
    %c0_7 = arith.constant 0 : index
    %c0_8 = arith.constant 0 : index
    %c0_9 = arith.constant 0 : index
    %c0_10 = arith.constant 0 : index
    %10 = vector.load %arg4[%c0_7, %c0_8, %c0_9, %c0_10] : memref<1x1x128x1xf32, #tpu.memory_space<vmem>>, vector<1x1x128x1xf32>
    %11 = vector.shape_cast %10 : vector<1x1x128x1xf32> to vector<128x1xf32>
    %12 = vector.shape_cast %7 : vector<128x1xf32> to vector<1x1x128x1xf32>
    tpu.vector_store %arg4[%c0_7, %c0_8, %c0_9, %c0_10], %12 {strides = array<i32>} : memref<1x1x128x1xf32, #tpu.memory_space<vmem>>, vector<1x1x128x1xf32>,
    %13 = arith.mulf %9, %9 : vector<128x256xf32>
    %cst_11 = arith.constant dense<0.000000e+00> : vector<128xf32>
    %14 = vector.multi_reduction <add>, %13, %cst_11 [1] : vector<128x256xf32> to vector<128xf32>
    %15 = vector.shape_cast %14 : vector<128xf32> to vector<128x1xf32>
    %c0_12 = arith.constant 0 : index
    %c0_13 = arith.constant 0 : index
    %c0_14 = arith.constant 0 : index
    %c0_15 = arith.constant 0 : index
    %16 = vector.load %arg5[%c0_12, %c0_13, %c0_14, %c0_15] : memref<1x1x128x1xf32, #tpu.memory_space<vmem>>, vector<1x1x128x1xf32>
    %17 = vector.shape_cast %16 : vector<1x1x128x1xf32> to vector<128x1xf32>
    %18 = vector.shape_cast %15 : vector<128x1xf32> to vector<1x1x128x1xf32>
    tpu.vector_store %arg5[%c0_12, %c0_13, %c0_14, %c0_15], %18 {strides = array<i32>} : memref<1x1x128x1xf32, #tpu.memory_space<vmem>>, vector<1x1x128x1xf32>,
    return
  }
  func.func @transform_0(%arg0: i32, %arg1: i32) -> (i32, i32, i32, i32) {
    %c0_i32 = arith.constant 0 : i32
    %c0_i32_0 = arith.constant 0 : i32
    %c0_i32_1 = arith.constant 0 : i32
    return %arg0, %arg1, %c0_i32, %c0_i32_0 : i32, i32, i32, i32
  }
  func.func @transform_1(%arg0: i32, %arg1: i32) -> (i32, i32) {
    %c0_i32 = arith.constant 0 : i32
    %c0_i32_0 = arith.constant 0 : i32
    %c0_i32_1 = arith.constant 0 : i32
    return %c0_i32, %c0_i32_0 : i32, i32
  }
  func.func @transform_2(%arg0: i32, %arg1: i32) -> (i32, i32, i32, i32) {
    %c0_i32 = arith.constant 0 : i32
    %c0_i32_0 = arith.constant 0 : i32
    %c0_i32_1 = arith.constant 0 : i32
    return %arg0, %arg1, %c0_i32, %c0_i32_0 : i32, i32, i32, i32
  }
  func.func @transform_3(%arg0: i32, %arg1: i32) -> (i32, i32, i32, i32) {
    %c0_i32 = arith.constant 0 : i32
    %c0_i32_0 = arith.constant 0 : i32
    %c0_i32_1 = arith.constant 0 : i32
    return %arg0, %arg1, %c0_i32, %c0_i32_0 : i32, i32, i32, i32
  }
}

module attributes {stable_mosaic.version = 11 : i64} {
  func.func @conv_bn_relu_kernel(%arg0: i32, %arg1: i32, %arg2: memref<1x1x36x256xbf16, #tpu.memory_space<vmem>>, %arg3: memref<128x36xbf16, #tpu.memory_space<vmem>>, %arg4: memref<128x1xf32, #tpu.memory_space<vmem>>, %arg5: memref<128x1xf32, #tpu.memory_space<vmem>>, %arg6: memref<1x8x256xf32, #tpu.memory_space<vmem>>) attributes {dimension_semantics = [#tpu.dimension_semantics<parallel>, #tpu.dimension_semantics<parallel>], iteration_bounds = array<i64: 2, 1>, scalar_prefetch = 0 : i64, scratch_operands = 0 : i64, tpu.core_type = #tpu.core_type<tc>, window_params = [{transform_indices = @transform_0, window_bounds = array<i64: 1, 1, 36, 256>}, {pipeline_mode = #tpu.pipeline_mode<synchronous>, transform_indices = @transform_1, window_bounds = array<i64: 128, 36>}, {pipeline_mode = #tpu.pipeline_mode<synchronous>, transform_indices = @transform_2, window_bounds = array<i64: 128, 1>}, {pipeline_mode = #tpu.pipeline_mode<synchronous>, transform_indices = @transform_3, window_bounds = array<i64: 128, 1>}, {transform_indices = @transform_4, window_bounds = array<i64: 1, 8, 256>}]} {
    %c0 = arith.constant 0 : index
    %c0_0 = arith.constant 0 : index
    %0 = vector.load %arg3[%c0, %c0_0] : memref<128x36xbf16, #tpu.memory_space<vmem>>, vector<128x36xbf16>
    %c0_1 = arith.constant 0 : index
    %c0_2 = arith.constant 0 : index
    %c0_3 = arith.constant 0 : index
    %c0_4 = arith.constant 0 : index
    %1 = vector.load %arg2[%c0_1, %c0_2, %c0_3, %c0_4] : memref<1x1x36x256xbf16, #tpu.memory_space<vmem>>, vector<1x1x36x256xbf16>
    %2 = vector.shape_cast %1 : vector<1x1x36x256xbf16> to vector<36x256xbf16>
    %cst = arith.constant dense<0.000000e+00> : vector<128x256xf32>
    %3 = tpu.matmul %0, %2, %cst {dimension_numbers = #tpu.dot_dimension_numbers<[1], [0], [0], [1], [0, 0, 1, 1], [], []>} : vector<128x36xbf16>, vector<36x256xbf16>, vector<128x256xf32> -> vector<128x256xf32>
    %c0_5 = arith.constant 0 : index
    %c0_6 = arith.constant 0 : index
    %4 = vector.load %arg4[%c0_5, %c0_6] : memref<128x1xf32, #tpu.memory_space<vmem>>, vector<128x1xf32>
    %5 = vector.broadcast %4 : vector<128x1xf32> to vector<128x256xf32>
    %6 = arith.mulf %3, %5 : vector<128x256xf32>
    %c0_7 = arith.constant 0 : index
    %c0_8 = arith.constant 0 : index
    %7 = vector.load %arg5[%c0_7, %c0_8] : memref<128x1xf32, #tpu.memory_space<vmem>>, vector<128x1xf32>
    %8 = vector.broadcast %7 : vector<128x1xf32> to vector<128x256xf32>
    %9 = arith.addf %6, %8 : vector<128x256xf32>
    %cst_9 = arith.constant 0.000000e+00 : f32
    %10 = vector.broadcast %cst_9 : f32 to vector<128x256xf32>
    %11 = arith.maximumf %9, %10 : vector<128x256xf32>
    %12 = vector.extract_strided_slice %11 {offsets = [0, 0], sizes = [8, 256], strides = [1, 1]} : vector<128x256xf32> to vector<8x256xf32>
    %c0_10 = arith.constant 0 : index
    %c0_11 = arith.constant 0 : index
    %c0_12 = arith.constant 0 : index
    %13 = vector.load %arg6[%c0_10, %c0_11, %c0_12] : memref<1x8x256xf32, #tpu.memory_space<vmem>>, vector<1x8x256xf32>
    %14 = vector.shape_cast %13 : vector<1x8x256xf32> to vector<8x256xf32>
    %15 = vector.shape_cast %12 : vector<8x256xf32> to vector<1x8x256xf32>
    tpu.vector_store %arg6[%c0_10, %c0_11, %c0_12], %15 {strides = array<i32>} : memref<1x8x256xf32, #tpu.memory_space<vmem>>, vector<1x8x256xf32>,
    return
  }
  func.func @transform_0(%arg0: i32, %arg1: i32) -> (i32, i32, i32, i32) {
    %c0_i32 = arith.constant 0 : i32
    %c0_i32_0 = arith.constant 0 : i32
    %c0_i32_1 = arith.constant 0 : i32
    return %arg0, %arg1, %c0_i32, %c0_i32_0 : i32, i32, i32, i32
  }
  func.func @transform_1(%arg0: i32, %arg1: i32) -> (i32, i32) {
    %c0_i32 = arith.constant 0 : i32
    %c0_i32_0 = arith.constant 0 : i32
    %c0_i32_1 = arith.constant 0 : i32
    return %c0_i32, %c0_i32_0 : i32, i32
  }
  func.func @transform_2(%arg0: i32, %arg1: i32) -> (i32, i32) {
    %c0_i32 = arith.constant 0 : i32
    %c0_i32_0 = arith.constant 0 : i32
    %c0_i32_1 = arith.constant 0 : i32
    return %c0_i32, %c0_i32_0 : i32, i32
  }
  func.func @transform_3(%arg0: i32, %arg1: i32) -> (i32, i32) {
    %c0_i32 = arith.constant 0 : i32
    %c0_i32_0 = arith.constant 0 : i32
    %c0_i32_1 = arith.constant 0 : i32
    return %c0_i32, %c0_i32_0 : i32, i32
  }
  func.func @transform_4(%arg0: i32, %arg1: i32) -> (i32, i32, i32) {
    %c0_i32 = arith.constant 0 : i32
    %c0_i32_0 = arith.constant 0 : i32
    return %arg0, %c0_i32, %arg1 : i32, i32, i32
  }
}

</mosaic_0001>

<bundles_post_ra>
// kernel: conv_bn_relu.3
= control target key start
LH: loop header
LB: loop body
LE: loop exit
PB: predicated region body
PF: predicated region fallthrough
CT: control target
= control target key end

     0   :  { %s680_s15 = smov 0   ;;  %s682_s16 = smov 0   ;;  %s755_s0 = inlined_call_operand.vmem [shape: bf16[2,1,36,256], index: 0, kind: input, shape index: {}]   ;;  %s756_s1 = inlined_call_operand.vmem [shape: bf16[128,36], index: 1, kind: input, shape index: {}]   ;;  %s757_s2 = inlined_call_operand.vmem [shape: f32[128,1], index: 2, kind: input, shape index: {}]   ;;  %s758_s3 = inlined_call_operand.vmem [shape: f32[128,1], index: 3, kind: input, shape index: {}]   ;;  %s759_s4 = inlined_call_operand.vmem [shape: f32[2,8,256], index: 4, kind: output, shape index: {}]  }
   0x1   :  { %s684_s17 = smov 0  }
   0x2 LB: > { %s26_s18 = sadd.s32 1, %s648_s16  ;;  %p551_p0 = scmp.ge.s32.totalorder %s652_s17, 1  ;;  %s652_s17 = sphi %s684_s17, %s14_s17   ;;  %s648_s16 = sphi %s682_s16, %s761_s16   ;;  %s644_s15 = sphi %s680_s15, %s760_s15  }
   0x3   : > { %p28_p1 = scmp.ge.s32.totalorder %s26_s18, 2  ;;  %p182_p2 = scmp.lt.s32.totalorder %s652_s17, 3 }
   0x5   : > { %s763_s18 = smov (%p28_p1, %s26_s18), 0  ;;  %p183_p3 = pnand %p551_p0, %p182_p2 }
   0x6   : > { %p216_p4 = scmp.lt.s32.totalorder (!%p183_p3), %s644_s15, 1  ;;  %v654_v0 = vmov (!%p183_p3), 0   ;;  %v437_v8 = vld [vmem:[%s757_s2] sm:$0xff] (!%p183_p3)  ;;  %vm347_vm0 = vcmask (!%p183_p3), 1041408   ;;  %vm322_vm1 = vcmask (!%p183_p3), 293888   ;;  %v624_v13 = vld [vmem:[%s756_s1 + $0x8] sm:$0xff] (!%p183_p3)  }
   0x7   : > { %186 = sbr.rel (%p183_p3) target bundleno = 270 (0x10e), region = 36  ;;  %386 = vmatprep.mubr.bf16.mxu0 (!%p183_p3), %v654_v0  ;;  %412 = vmatprep.mubr.bf16.mxu1 (!%p183_p3), %v654_v0  ;;  %v445_v9 = vld [vmem:[%s758_s3] sm:$0xff] (!%p183_p3)  ;;  %v625_v14 = vld [vmem:[%s756_s1 + $0x28] sm:$0xff] (!%p183_p3)   ;;  %v626_v15 = vld [vmem:[%s756_s1 + $0x10] sm:$0xff] (!%p183_p3)  }
   0x8   : > { %613 = vset.pattern.permute.xlu0 (!%p183_p3), %v654_v0  ;;  %v622_v11 = vld [vmem:[%s756_s1] sm:$0xff] (!%p183_p3)   ;;  %v627_v16 = vld [vmem:[%s756_s1 + $0x30] sm:$0xff] (!%p183_p3)   ;;  %v628_v17 = vld [vmem:[%s756_s1 + $0x18] sm:$0xff] (!%p183_p3)  }
   0x9   : > { %440 = vperm.xlu0 (!%p183_p3), %613, %v437_v8   ;;  %v623_v12 = vld [vmem:[%s756_s1 + $0x20] sm:$0xff] (!%p183_p3)   ;;  %v629_v18 = vld [vmem:[%s756_s1 + $0x38] sm:$0xff] (!%p183_p3)  }
   0xd   : > { %448 = vperm.xlu0 (!%p183_p3), %613, %v445_v9  }
   0xe   : > { %s765_s15 = smov (!%p216_p4, %s644_s15), 1 }
   0xf   : > { %s587_s19 = smul.u32 40, %s765_s15  ;;  %s580_s21 = sshll.u32 %s765_s15, 4 }
  0x10   : > { %s233_s24 = scalar_lea.vmem %s759_s4, %s580_s21 }
  0x11   : > { %s224_s22 = scalar_lea.vmem %s755_s0, %s587_s19 }
  0x12   : > { %v614_v1 = vld [vmem:[%s224_s22 + $0x4] ss:$8 sps:$4 sm:$0xff]   ;;  %v616_v2 = vld [vmem:[%s224_s22] ss:$8 sps:$4 sm:$0xff]   ;;  %v617_v3 = vld [vmem:[%s224_s22 + $0x14] ss:$8 sps:$4 sm:$0xff]  }
  0x13   : > { %354 = vmatprep.subr.bf16.mxu0 %v614_v1  ;;  %581 = vmatprep.subr.bf16.mxu1 %v614_v1  ;;  %v256_v4 = vld [vmem:[%s224_s22 + $0x20] sm:$0x33]  ;;  %v619_v5 = vld [vmem:[%s224_s22 + $0x10] ss:$8 sps:$4 sm:$0xff]  }
  0x14   : > { %355 = vmatpush1.bf16.msra.mxu0 %v616_v2  ;;  %584 = vmatpush1.bf16.msra.mxu1 %v616_v2  ;;  %v568_v6 = vcombine.high %v256_v4, %v256_v4  ;;  %v567_v7 = vcombine.low %v256_v4, %v256_v4 }
  0x15   : > { %356 = vmatprep.subr.bf16.mxu0 %v617_v3  ;;  %582 = vmatprep.subr.bf16.mxu1 %v617_v3 }
  0x16   : > { %v349_v10 = vsel %vm347_vm0, %v567_v7, 0 }
  0x18   : > { %357 = vmatpush1.bf16.msra.mxu0 %v619_v5  ;;  %585 = vmatpush1.bf16.msra.mxu1 %v619_v5 }
  0x19   : > { %569 = vmatprep.subr.msk.bf16.mxu0 %vm347_vm0, %v568_v6  ;;  %583 = vmatprep.subr.msk.bf16.mxu1 %vm347_vm0, %v568_v6 }
  0x1c   : > { %359 = vmatpush1.bf16.msra.mxu0 %v349_v10  ;;  %586 = vmatpush1.bf16.msra.mxu1 %v349_v10 }
  0x1f   : > { %570 = vmatmul.mubr.msk.bf16.vlgmr.msra.gmra.mrb[0].mxu0 %vm322_vm1, %v622_v11  ;;  %574 = vmatmul.mubr.msk.bf16.vlgmr.msra.gmra.mrb[0].mxu1 %vm322_vm1, %v623_v12 }
  0x20   : > { %394 = vmatprep.mubr.bf16.mxu0 %v654_v0  ;;  %418 = vmatprep.mubr.bf16.mxu1 %v654_v0 }
  0x27   : > { %571 = vmatmul.mubr.msk.bf16.gmra.mrb[4].mxu0 %vm322_vm1, %v624_v13  ;;  %575 = vmatmul.mubr.msk.bf16.gmra.mrb[4].mxu1 %vm322_vm1, %v625_v14 }
  0x28   : > { %400 = vmatprep.mubr.bf16.mxu0 %v654_v0  ;;  %424 = vmatprep.mubr.bf16.mxu1 %v654_v0 }
  0x2f   : > { %572 = vmatmul.mubr.msk.bf16.gmra.mrb[8].mxu0 %vm322_vm1, %v626_v15  ;;  %576 = vmatmul.mubr.msk.bf16.gmra.mrb[8].mxu1 %vm322_vm1, %v627_v16 }
  0x30   : > { %406 = vmatprep.mubr.bf16.mxu0 %v654_v0  ;;  %430 = vmatprep.mubr.bf16.mxu1 %v654_v0 }
  0x37   : > { %573 = vmatmul.mubr.msk.bf16.gmra.mrb[12].mxu0 %vm322_vm1, %v628_v17  ;;  %577 = vmatmul.mubr.msk.bf16.gmra.mrb[12].mxu1 %vm322_vm1, %v629_v18 }
  0x88   : > { %v441_v19 = vpop.permute.xlu0 %440 }
  0x8c   : > { %v449_v20 = vpop.permute.xlu0 %448 }
  0xf2   : > { %v388_v21 = vpop.f32.mrb[0].mxu0  ;;  %v414_v22 = vpop.f32.mrb[0].mxu1 }
  0xf3   : > { %v443_v23 = vmul.f32 %v441_v19, %v388_v21  ;;  %v390_v24 = vpop.f32.mrb[1].mxu0  ;;  %v415_v25 = vpop.f32.mrb[1].mxu1 }
  0xf4   : > { %v444_v26 = vmul.f32 %v441_v19, %v390_v24  ;;  %v392_v27 = vpop.f32.mrb[2].mxu0  ;;  %v416_v28 = vpop.f32.mrb[2].mxu1 }
  0xf5   : > { %v451_v29 = vadd.f32 %v449_v20, %v443_v23  ;;  %v393_v30 = vpop.f32.mrb[3].mxu0  ;;  %v417_v31 = vpop.f32.mrb[3].mxu1 }
  0xf6   : > { %v452_v32 = vadd.f32 %v449_v20, %v444_v26 }
  0xf7   : > { %v453_v33 = vmax.f32 %v451_v29, 0.0 }
  0xf8   : > { %v454_v34 = vmax.f32 %v452_v32, 0.0 }
  0xf9   : > { %455 = vst [vmem:[%s233_s24] sm:$0xff] %v453_v33 }
  0xfa   : > { %456 = vst [vmem:[%s233_s24 + $0x8] sm:$0xff] %v454_v34  ;;  %v396_v35 = vpop.f32.mrb[4].mxu0  ;;  %v420_v36 = vpop.f32.mrb[4].mxu1 }
  0xfb   : > { %v397_v37 = vpop.f32.mrb[5].mxu0  ;;  %v421_v38 = vpop.f32.mrb[5].mxu1 }
  0xfc   : > { %v398_v39 = vpop.f32.mrb[6].mxu0  ;;  %v422_v40 = vpop.f32.mrb[6].mxu1 }
  0xfd   : > { %v399_v41 = vpop.f32.mrb[7].mxu0  ;;  %v423_v42 = vpop.f32.mrb[7].mxu1 }
 0x102   : > { %v402_v43 = vpop.f32.mrb[8].mxu0  ;;  %v426_v44 = vpop.f32.mrb[8].mxu1 }
 0x103   : > { %v403_v45 = vpop.f32.mrb[9].mxu0  ;;  %v427_v46 = vpop.f32.mrb[9].mxu1 }
 0x104   : > { %v404_v47 = vpop.f32.mrb[10].mxu0  ;;  %v428_v48 = vpop.f32.mrb[10].mxu1 }
 0x105   : > { %v405_v49 = vpop.f32.mrb[11].mxu0  ;;  %v429_v50 = vpop.f32.mrb[11].mxu1 }
 0x10a   : > { %v408_v51 = vpop.f32.mrb[12].mxu0  ;;  %v432_v52 = vpop.f32.mrb[12].mxu1 }
 0x10b   : > { %v409_v53 = vpop.f32.mrb[13].mxu0  ;;  %v433_v54 = vpop.f32.mrb[13].mxu1 }
 0x10c   : > { %v410_v55 = vpop.f32.mrb[14].mxu0  ;;  %v434_v56 = vpop.f32.mrb[14].mxu1 }
 0x10d   : > { %v411_v57 = vpop.f32.mrb[15].mxu0  ;;  %v435_v58 = vpop.f32.mrb[15].mxu1 }
 0x10e PF: > { %s14_s17 = sadd.s32 1, %s652_s17   ;;  %s760_s15 = smov %s648_s16 }
 0x10f   : > { %p11_p5 = scmp.ge.s32.totalorder %s14_s17, 4   ;;  %s761_s16 = smov %s763_s18 }
 0x111   :  { %13 = sbr.rel (!%p11_p5) target bundleno = 2 (0x2), region = 66 }

// kernel: conv_bn_relu.2
= control target key start
LH: loop header
LB: loop body
LE: loop exit
PB: predicated region body
PF: predicated region fallthrough
CT: control target
= control target key end

     0   :  { %s946_s12 = smov 0   ;;  %s948_s13 = smov 0   ;;  %s1218_s0 = inlined_call_operand.vmem [shape: bf16[2,1,36,256], index: 0, kind: input, shape index: {}]   ;;  %s1219_s1 = inlined_call_operand.vmem [shape: bf16[128,36], index: 1, kind: input, shape index: {}]   ;;  %s1220_s2 = inlined_call_operand.vmem [shape: f32[2,1,128,1], index: 2, kind: output, shape index: {0}]   ;;  %s1221_s3 = inlined_call_operand.vmem [shape: f32[2,1,128,1], index: 3, kind: output, shape index: {1}]  }
   0x1   :  { %s950_s14 = smov 0  }
   0x2 LB: > { %s26_s15 = sadd.s32 1, %s919_s13  ;;  %p820_p0 = scmp.ge.s32.totalorder %s923_s14, 1  ;;  %s923_s14 = sphi %s950_s14, %s14_s14   ;;  %s919_s13 = sphi %s948_s13, %s1223_s13   ;;  %s915_s12 = sphi %s946_s12, %s1222_s12  }
   0x3   : > { %p28_p1 = scmp.ge.s32.totalorder %s26_s15, 2  ;;  %p162_p2 = scmp.lt.s32.totalorder %s923_s14, 3 }
   0x5   : > { %s1225_s15 = smov (%p28_p1, %s26_s15), 0  ;;  %p163_p3 = pnand %p820_p0, %p162_p2 }
   0x6   : > { %p203_p4 = scmp.lt.s32.totalorder (!%p163_p3), %s915_s12, 1  ;;  %v925_v0 = vmov (!%p163_p3), 0   ;;  %vm342_vm0 = vcmask (!%p163_p3), 1041408   ;;  %v893_v9 = vld [vmem:[%s1219_s1] sm:$0xff] (!%p163_p3)   ;;  %vm317_vm1 = vcmask (!%p163_p3), 293888   ;;  %v895_v11 = vld [vmem:[%s1219_s1 + $0x8] sm:$0xff] (!%p163_p3)  }
   0x7   : > { %166 = sbr.rel (%p163_p3) target bundleno = 576 (0x240), region = 28  ;;  %381 = vmatprep.mubr.bf16.mxu0 (!%p163_p3), %v925_v0  ;;  %421 = vmatprep.mubr.bf16.mxu1 (!%p163_p3), %v925_v0  ;;  %v894_v10 = vld [vmem:[%s1219_s1 + $0x20] sm:$0xff] (!%p163_p3)   ;;  %v896_v12 = vld [vmem:[%s1219_s1 + $0x28] sm:$0xff] (!%p163_p3)   ;;  %v897_v13 = vld [vmem:[%s1219_s1 + $0x10] sm:$0xff] (!%p163_p3)   ;;  %vm558_vm2 = vcmask (!%p163_p3), 7168  }
   0x8   : > { %v898_v14 = vld [vmem:[%s1219_s1 + $0x30] sm:$0xff] (!%p163_p3)   ;;  %v899_v15 = vld [vmem:[%s1219_s1 + $0x18] sm:$0xff] (!%p163_p3)  }
   0x9   : > { %v900_v16 = vld [vmem:[%s1219_s1 + $0x38] sm:$0xff] (!%p163_p3)  }
   0xe   : > { %s1227_s12 = smov (!%p203_p4, %s915_s12), 1 }
   0xf   : > { %s859_s16 = smul.u32 40, %s1227_s12  ;;  %s851_s9 = sshll.u32 %s1227_s12, 7 }
  0x11   : > { %s211_s19 = scalar_lea.vmem %s1218_s0, %s859_s16  ;;  %s1104_s16 = scalar_lea.vmem %s1220_s2, %s851_s9 }
  0x12   : > { %v885_v1 = vld [vmem:[%s211_s19 + $0x4] ss:$8 sps:$4 sm:$0xff]   ;;  %v887_v2 = vld [vmem:[%s211_s19] ss:$8 sps:$4 sm:$0xff]   ;;  %v888_v3 = vld [vmem:[%s211_s19 + $0x14] ss:$8 sps:$4 sm:$0xff]  }
  0x13   : > { %349 = vmatprep.subr.bf16.mxu0 %v885_v1  ;;  %853 = vmatprep.subr.bf16.mxu1 %v885_v1  ;;  %v251_v4 = vld [vmem:[%s211_s19 + $0x20] sm:$0x33]  ;;  %v890_v5 = vld [vmem:[%s211_s19 + $0x10] ss:$8 sps:$4 sm:$0xff]   ;;  %s1175_s19 = scalar_lea.vmem %s1221_s3, %s851_s9 }
  0x14   : > { %350 = vmatpush1.bf16.msra.mxu0 %v887_v2  ;;  %856 = vmatpush1.bf16.msra.mxu1 %v887_v2  ;;  %v839_v6 = vcombine.high %v251_v4, %v251_v4  ;;  %v838_v7 = vcombine.low %v251_v4, %v251_v4 }
  0x15   : > { %351 = vmatprep.subr.bf16.mxu0 %v888_v3  ;;  %854 = vmatprep.subr.bf16.mxu1 %v888_v3 }
  0x16   : > { %v344_v8 = vsel %vm342_vm0, %v838_v7, 0 }
  0x18   : > { %352 = vmatpush1.bf16.msra.mxu0 %v890_v5  ;;  %857 = vmatpush1.bf16.msra.mxu1 %v890_v5 }
  0x19   : > { %840 = vmatprep.subr.msk.bf16.mxu0 %vm342_vm0, %v839_v6  ;;  %855 = vmatprep.subr.msk.bf16.mxu1 %vm342_vm0, %v839_v6 }
  0x1c   : > { %354 = vmatpush1.bf16.msra.mxu0 %v344_v8  ;;  %858 = vmatpush1.bf16.msra.mxu1 %v344_v8 }
  0x1f   : > { %841 = vmatmul.mubr.msk.bf16.vlgmr.msra.gmra.mrb[0].mxu0 %vm317_vm1, %v893_v9  ;;  %845 = vmatmul.mubr.msk.bf16.vlgmr.msra.gmra.mrb[0].mxu1 %vm317_vm1, %v894_v10 }
  0x20   : > { %391 = vmatprep.mubr.bf16.mxu0 %v925_v0  ;;  %431 = vmatprep.mubr.bf16.mxu1 %v925_v0 }
  0x27   : > { %842 = vmatmul.mubr.msk.bf16.gmra.mrb[4].mxu0 %vm317_vm1, %v895_v11  ;;  %846 = vmatmul.mubr.msk.bf16.gmra.mrb[4].mxu1 %vm317_vm1, %v896_v12 }
  0x28   : > { %401 = vmatprep.mubr.bf16.mxu0 %v925_v0  ;;  %441 = vmatprep.mubr.bf16.mxu1 %v925_v0 }
  0x2f   : > { %843 = vmatmul.mubr.msk.bf16.gmra.mrb[8].mxu0 %vm317_vm1, %v897_v13  ;;  %847 = vmatmul.mubr.msk.bf16.gmra.mrb[8].mxu1 %vm317_vm1, %v898_v14 }
  0x30   : > { %411 = vmatprep.mubr.bf16.mxu0 %v925_v0  ;;  %451 = vmatprep.mubr.bf16.mxu1 %v925_v0 }
  0x37   : > { %844 = vmatmul.mubr.msk.bf16.gmra.mrb[12].mxu0 %vm317_vm1, %v899_v15  ;;  %848 = vmatmul.mubr.msk.bf16.gmra.mrb[12].mxu1 %vm317_vm1, %v900_v16 }
  0xf2   : > { %v1002_v17 = vpop.f32.mrb[0].mxu0  ;;  %v1004_v18 = vpop.f32.mrb[0].mxu1 }
  0xf3   : > { %v1006_v19 = vpop.f32.mrb[1].mxu0  ;;  %v1008_v20 = vpop.f32.mrb[1].mxu1 }
  0xf4   : > { %v1010_v21 = vpop.f32.mrb[2].mxu0  ;;  %v1012_v22 = vpop.f32.mrb[2].mxu1  ;;  %v462_v23 = vadd.f32 %v1006_v19, %v1002_v17  ;;  %v486_v24 = vadd.f32 %v1008_v20, %v1004_v18 }
  0xf5   : > { %v1018_v25 = vpop.f32.mrb[3].mxu0  ;;  %v1020_v26 = vpop.f32.mrb[3].mxu1 }
  0xf6   : > { %463 = vadd.xlane.f32.xlu0 %v462_v23  ;;  %v489_v27 = vadd.f32 %v1020_v26, %v1012_v22  ;;  %v465_v28 = vadd.f32 %v1018_v25, %v1010_v21 }
  0xf8   : > { %490 = vadd.xlane.f32.xlu1 %v489_v27 }
  0xfa   : > { %487 = vadd.xlane.f32.xlu0 %v486_v24  ;;  %v1026_v29 = vpop.f32.mrb[4].mxu0  ;;  %v1028_v30 = vpop.f32.mrb[4].mxu1 }
  0xfb   : > { %v1030_v31 = vpop.f32.mrb[5].mxu0  ;;  %v1032_v32 = vpop.f32.mrb[5].mxu1 }
  0xfc   : > { %v1034_v33 = vpop.f32.mrb[6].mxu0  ;;  %v468_v34 = vadd.f32 %v1030_v31, %v1026_v29  ;;  %v1038_v35 = vpop.f32.mrb[6].mxu1  ;;  %v492_v36 = vadd.f32 %v1032_v32, %v1028_v30 }
  0xfd   : > { %v1042_v37 = vpop.f32.mrb[7].mxu0  ;;  %v1044_v38 = vpop.f32.mrb[7].mxu1 }
  0xfe   : > { %466 = vadd.xlane.f32.xlu0 %v465_v28  ;;  %469 = vadd.xlane.f32.xlu1 %v468_v34  ;;  %v471_v39 = vadd.f32 %v1042_v37, %v1034_v33  ;;  %v495_v40 = vadd.f32 %v1044_v38, %v1038_v35 }
 0x102   : > { %493 = vadd.xlane.f32.xlu0 %v492_v36  ;;  %472 = vadd.xlane.f32.xlu1 %v471_v39  ;;  %v1050_v41 = vpop.f32.mrb[8].mxu0  ;;  %v1052_v42 = vpop.f32.mrb[8].mxu1 }
 0x103   : > { %v1054_v43 = vpop.f32.mrb[9].mxu0  ;;  %v1056_v44 = vpop.f32.mrb[9].mxu1 }
 0x104   : > { %v474_v45 = vadd.f32 %v1054_v43, %v1050_v41  ;;  %v1060_v46 = vpop.f32.mrb[10].mxu0  ;;  %v1062_v47 = vpop.f32.mrb[10].mxu1  ;;  %v498_v48 = vadd.f32 %v1056_v44, %v1052_v42 }
 0x105   : > { %v1066_v49 = vpop.f32.mrb[11].mxu0  ;;  %v1068_v50 = vpop.f32.mrb[11].mxu1 }
 0x106   : > { %496 = vadd.xlane.f32.xlu1 %v495_v40  ;;  %475 = vadd.xlane.f32.xlu0 %v474_v45  ;;  %v477_v51 = vadd.f32 %v1066_v49, %v1060_v46  ;;  %v501_v52 = vadd.f32 %v1068_v50, %v1062_v47 }
 0x10a   : > { %499 = vadd.xlane.f32.xlu0 %v498_v48  ;;  %478 = vadd.xlane.f32.xlu1 %v477_v51  ;;  %v1074_v53 = vpop.f32.mrb[12].mxu0  ;;  %v1076_v54 = vpop.f32.mrb[12].mxu1 }
 0x10b   : > { %v1078_v55 = vpop.f32.mrb[13].mxu0  ;;  %v1080_v56 = vpop.f32.mrb[13].mxu1 }
 0x10c   : > { %v480_v57 = vadd.f32 %v1078_v55, %v1074_v53  ;;  %v1084_v58 = vpop.f32.mrb[14].mxu0  ;;  %v1086_v59 = vpop.f32.mrb[14].mxu1  ;;  %v504_v60 = vadd.f32 %v1080_v56, %v1076_v54 }
 0x10d   : > { %v1090_v61 = vpop.f32.mrb[15].mxu0  ;;  %v1092_v62 = vpop.f32.mrb[15].mxu1 }
 0x10e   : > { %502 = vadd.xlane.f32.xlu1 %v501_v52  ;;  %481 = vadd.xlane.f32.xlu0 %v480_v57  ;;  %v483_v63 = vadd.f32 %v1090_v61, %v1084_v58  ;;  %v507_v0 = vadd.f32 %v1092_v62, %v1086_v59 }
 0x112   : > { %505 = vadd.xlane.f32.xlu0 %v504_v60  ;;  %484 = vadd.xlane.f32.xlu1 %v483_v63 }
 0x116   : > { %508 = vadd.xlane.f32.xlu1 %v507_v0 }
 0x183   : > { %v464_v1 = vpop.xlane.xlu0 %463 }
 0x184   : > { %v510_v2 = vmul.f32 0.00390625, %v464_v1 }
 0x185   : > { %v491_v3 = vpop.xlane.xlu1 %490 }
 0x186   : > { %559 = vst.msk [vmem:[%s1104_s16] sm:$0xff] %vm558_vm2, %v510_v2  ;;  %v519_v4 = vmul.f32 0.00390625, %v491_v3  ;;  %v526_v5 = vsub.f32 %v1002_v17, %v510_v2  ;;  %v527_v6 = vsub.f32 %v1006_v19, %v510_v2 }
 0x187   : > { %v488_v7 = vpop.xlane.xlu0 %487 }
 0x188   : > { %568 = vst.msk [vmem:[%s1104_s16 + $0x48] sm:$0xff] %vm558_vm2, %v519_v4  ;;  %v518_v8 = vmul.f32 0.00390625, %v488_v7  ;;  %v575_v9 = vmul.f32 %v526_v5, %v526_v5  ;;  %v576_v10 = vmul.f32 %v527_v6, %v527_v6  ;;  %v544_v11 = vsub.f32 %v1012_v22, %v519_v4 }
 0x189   : > { %v545_v12 = vsub.f32 %v1020_v26, %v519_v4 }
 0x18a   : > { %567 = vst.msk [vmem:[%s1104_s16 + $0x40] sm:$0xff] %vm558_vm2, %v518_v8  ;;  %v607_v13 = vadd.f32 %v576_v10, %v575_v9  ;;  %v542_v14 = vsub.f32 %v1004_v18, %v518_v8  ;;  %v543_v15 = vsub.f32 %v1008_v20, %v518_v8  ;;  %v593_v16 = vmul.f32 %v544_v11, %v544_v11 }
 0x18b   : > { %v467_v17 = vpop.xlane.xlu0 %466  ;;  %v470_v19 = vpop.xlane.xlu1 %469  ;;  %v594_v23 = vmul.f32 %v545_v12, %v545_v12 }
 0x18c   : > { %v511_v24 = vmul.f32 0.00390625, %v467_v17  ;;  %v512_v27 = vmul.f32 0.00390625, %v470_v19  ;;  %608 = vadd.xlane.f32.xlu0 %v607_v13  ;;  %v591_v28 = vmul.f32 %v542_v14, %v542_v14  ;;  %v592_v22 = vmul.f32 %v543_v15, %v543_v15 }
 0x18d   : > { %v634_v34 = vadd.f32 %v594_v23, %v593_v16 }
 0x18e   : > { %560 = vst.msk [vmem:[%s1104_s16 + $0x8] sm:$0xff] %vm558_vm2, %v511_v24  ;;  %561 = vst.msk [vmem:[%s1104_s16 + $0x10] sm:$0xff] %vm558_vm2, %v512_v27  ;;  %v631_v26 = vadd.f32 %v592_v22, %v591_v28  ;;  %v530_v18 = vsub.f32 %v1026_v29, %v512_v27  ;;  %v531_v20 = vsub.f32 %v1030_v31, %v512_v27 }
 0x18f   : > { %v528_v36 = vsub.f32 %v1010_v21, %v511_v24  ;;  %v494_v39 = vpop.xlane.xlu0 %493  ;;  %v473_v40 = vpop.xlane.xlu1 %472  ;;  %v529_v45 = vsub.f32 %v1018_v25, %v511_v24 }
 0x190   : > { %v520_v48 = vmul.f32 0.00390625, %v494_v39  ;;  %v513_v51 = vmul.f32 0.00390625, %v473_v40  ;;  %632 = vadd.xlane.f32.xlu0 %v631_v26  ;;  %v579_v52 = vmul.f32 %v530_v18, %v530_v18  ;;  %v580_v57 = vmul.f32 %v531_v20, %v531_v20 }
 0x191   : > { %v577_v60 = vmul.f32 %v528_v36, %v528_v36  ;;  %v578_v63 = vmul.f32 %v529_v45, %v529_v45 }
 0x192   : > { %569 = vst.msk [vmem:[%s1104_s16 + $0x50] sm:$0xff] %vm558_vm2, %v520_v48  ;;  %562 = vst.msk [vmem:[%s1104_s16 + $0x18] sm:$0xff] %vm558_vm2, %v513_v51  ;;  %v613_v29 = vadd.f32 %v580_v57, %v579_v52  ;;  %v546_v31 = vsub.f32 %v1028_v30, %v520_v48  ;;  %v547_v21 = vsub.f32 %v1032_v32, %v520_v48 }
 0x193   : > { %v532_v25 = vsub.f32 %v1034_v33, %v513_v51  ;;  %v497_v0 = vpop.xlane.xlu1 %496  ;;  %v476_v1 = vpop.xlane.xlu0 %475  ;;  %v610_v2 = vadd.f32 %v578_v63, %v577_v60  ;;  %v533_v3 = vsub.f32 %v1042_v37, %v513_v51 }
 0x194   : > { %v521_v4 = vmul.f32 0.00390625, %v497_v0  ;;  %v514_v5 = vmul.f32 0.00390625, %v476_v1  ;;  %614 = vadd.xlane.f32.xlu0 %v613_v29  ;;  %v595_v6 = vmul.f32 %v546_v31, %v546_v31  ;;  %v596_v7 = vmul.f32 %v547_v21, %v547_v21 }
 0x195   : > { %611 = vadd.xlane.f32.xlu1 %v610_v2  ;;  %v581_v8 = vmul.f32 %v532_v25, %v532_v25  ;;  %v582_v9 = vmul.f32 %v533_v3, %v533_v3 }
 0x196   : > { %570 = vst.msk [vmem:[%s1104_s16 + $0x58] sm:$0xff] %vm558_vm2, %v521_v4  ;;  %563 = vst.msk [vmem:[%s1104_s16 + $0x20] sm:$0xff] %vm558_vm2, %v514_v5  ;;  %v637_v30 = vadd.f32 %v596_v7, %v595_v6  ;;  %v534_v32 = vsub.f32 %v1050_v41, %v514_v5  ;;  %v535_v33 = vsub.f32 %v1054_v43, %v514_v5 }
 0x197   : > { %v548_v37 = vsub.f32 %v1038_v35, %v521_v4  ;;  %v500_v10 = vpop.xlane.xlu0 %499  ;;  %v479_v11 = vpop.xlane.xlu1 %478  ;;  %v616_v12 = vadd.f32 %v582_v9, %v581_v8  ;;  %v549_v13 = vsub.f32 %v1044_v38, %v521_v4 }
 0x198   : > { %v522_v14 = vmul.f32 0.00390625, %v500_v10  ;;  %v515_v15 = vmul.f32 0.00390625, %v479_v11  ;;  %638 = vadd.xlane.f32.xlu0 %v637_v30  ;;  %v583_v16 = vmul.f32 %v534_v32, %v534_v32  ;;  %v584_v17 = vmul.f32 %v535_v33, %v535_v33 }
 0x199   : > { %635 = vadd.xlane.f32.xlu1 %v634_v34  ;;  %v597_v19 = vmul.f32 %v548_v37, %v548_v37  ;;  %v598_v23 = vmul.f32 %v549_v13, %v549_v13 }
 0x19a   : > { %571 = vst.msk [vmem:[%s1104_s16 + $0x60] sm:$0xff] %vm558_vm2, %v522_v14  ;;  %564 = vst.msk [vmem:[%s1104_s16 + $0x28] sm:$0xff] %vm558_vm2, %v515_v15  ;;  %v619_v41 = vadd.f32 %v584_v17, %v583_v16  ;;  %v550_v35 = vsub.f32 %v1052_v42, %v522_v14  ;;  %v551_v43 = vsub.f32 %v1056_v44, %v522_v14 }
 0x19b   : > { %v536_v38 = vsub.f32 %v1060_v46, %v515_v15  ;;  %v503_v24 = vpop.xlane.xlu1 %502  ;;  %v482_v27 = vpop.xlane.xlu0 %481  ;;  %v640_v28 = vadd.f32 %v598_v23, %v597_v19  ;;  %v537_v22 = vsub.f32 %v1066_v49, %v515_v15 }
 0x19c   : > { %v523_v34 = vmul.f32 0.00390625, %v503_v24  ;;  %v516_v26 = vmul.f32 0.00390625, %v482_v27  ;;  %620 = vadd.xlane.f32.xlu0 %v619_v41  ;;  %v599_v18 = vmul.f32 %v550_v35, %v550_v35  ;;  %v600_v20 = vmul.f32 %v551_v43, %v551_v43 }
 0x19d   : > { %617 = vadd.xlane.f32.xlu1 %v616_v12  ;;  %v585_v36 = vmul.f32 %v536_v38, %v536_v38  ;;  %v586_v39 = vmul.f32 %v537_v22, %v537_v22 }
 0x19e   : > { %572 = vst.msk [vmem:[%s1104_s16 + $0x68] sm:$0xff] %vm558_vm2, %v523_v34  ;;  %565 = vst.msk [vmem:[%s1104_s16 + $0x30] sm:$0xff] %vm558_vm2, %v516_v26  ;;  %v643_v42 = vadd.f32 %v600_v20, %v599_v18  ;;  %v538_v44 = vsub.f32 %v1074_v53, %v516_v26  ;;  %v539_v46 = vsub.f32 %v1078_v55, %v516_v26 }
 0x19f   : > { %v552_v49 = vsub.f32 %v1062_v47, %v523_v34  ;;  %v506_v40 = vpop.xlane.xlu0 %505  ;;  %v485_v45 = vpop.xlane.xlu1 %484  ;;  %v622_v48 = vadd.f32 %v586_v39, %v585_v36  ;;  %v553_v51 = vsub.f32 %v1068_v50, %v523_v34 }
 0x1a0   : > { %v524_v52 = vmul.f32 0.00390625, %v506_v40  ;;  %v517_v57 = vmul.f32 0.00390625, %v485_v45  ;;  %644 = vadd.xlane.f32.xlu0 %v643_v42  ;;  %v587_v60 = vmul.f32 %v538_v44, %v538_v44  ;;  %v588_v63 = vmul.f32 %v539_v46, %v539_v46 }
 0x1a1   : > { %641 = vadd.xlane.f32.xlu1 %v640_v28  ;;  %v601_v29 = vmul.f32 %v552_v49, %v552_v49  ;;  %v602_v31 = vmul.f32 %v553_v51, %v553_v51 }
 0x1a2   : > { %573 = vst.msk [vmem:[%s1104_s16 + $0x70] sm:$0xff] %vm558_vm2, %v524_v52  ;;  %566 = vst.msk [vmem:[%s1104_s16 + $0x38] sm:$0xff] %vm558_vm2, %v517_v57  ;;  %v625_v53 = vadd.f32 %v588_v63, %v587_v60  ;;  %v554_v47 = vsub.f32 %v1076_v54, %v524_v52  ;;  %v555_v55 = vsub.f32 %v1080_v56, %v524_v52 }
 0x1a3   : > { %v540_v50 = vsub.f32 %v1084_v58, %v517_v57  ;;  %v509_v21 = vpop.xlane.xlu1 %508  ;;  %v646_v25 = vadd.f32 %v602_v31, %v601_v29  ;;  %v541_v0 = vsub.f32 %v1090_v61, %v517_v57 }
 0x1a4   : > { %v525_v1 = vmul.f32 0.00390625, %v509_v21  ;;  %626 = vadd.xlane.f32.xlu0 %v625_v53  ;;  %v603_v2 = vmul.f32 %v554_v47, %v554_v47  ;;  %v604_v3 = vmul.f32 %v555_v55, %v555_v55 }
 0x1a5   : > { %v589_v4 = vmul.f32 %v540_v50, %v540_v50  ;;  %623 = vadd.xlane.f32.xlu1 %v622_v48  ;;  %v590_v5 = vmul.f32 %v541_v0, %v541_v0 }
 0x1a6   : > { %574 = vst.msk [vmem:[%s1104_s16 + $0x78] sm:$0xff] %vm558_vm2, %v525_v1  ;;  %v649_v6 = vadd.f32 %v604_v3, %v603_v2  ;;  %v556_v54 = vsub.f32 %v1086_v59, %v525_v1  ;;  %v557_v56 = vsub.f32 %v1092_v62, %v525_v1 }
 0x1a7   : > { %v628_v58 = vadd.f32 %v590_v5, %v589_v4 }
 0x1a8   : > { %650 = vadd.xlane.f32.xlu0 %v649_v6  ;;  %v605_v7 = vmul.f32 %v556_v54, %v556_v54  ;;  %v606_v8 = vmul.f32 %v557_v56, %v557_v56 }
 0x1a9   : > { %647 = vadd.xlane.f32.xlu1 %v646_v25 }
 0x1aa   : > { %v652_v61 = vadd.f32 %v606_v8, %v605_v7 }
 0x1ad   : > { %629 = vadd.xlane.f32.xlu1 %v628_v58 }
 0x1b1   : > { %653 = vadd.xlane.f32.xlu1 %v652_v61 }
 0x219   : > { %v609_v59 = vpop.xlane.xlu0 %608 }
 0x21a   : > { %655 = vst.msk [vmem:[%s1175_s19] sm:$0xff] %vm558_vm2, %v609_v59 }
 0x21d   : > { %v633_v62 = vpop.xlane.xlu0 %632 }
 0x21e   : > { %663 = vst.msk [vmem:[%s1175_s19 + $0x40] sm:$0xff] %vm558_vm2, %v633_v62 }
 0x221   : > { %v615_v9 = vpop.xlane.xlu0 %614 }
 0x222   : > { %657 = vst.msk [vmem:[%s1175_s19 + $0x10] sm:$0xff] %vm558_vm2, %v615_v9  ;;  %v612_v30 = vpop.xlane.xlu1 %611 }
 0x223   : > { %656 = vst.msk [vmem:[%s1175_s19 + $0x8] sm:$0xff] %vm558_vm2, %v612_v30 }
 0x225   : > { %v639_v32 = vpop.xlane.xlu0 %638 }
 0x226   : > { %665 = vst.msk [vmem:[%s1175_s19 + $0x50] sm:$0xff] %vm558_vm2, %v639_v32  ;;  %v636_v33 = vpop.xlane.xlu1 %635 }
 0x227   : > { %664 = vst.msk [vmem:[%s1175_s19 + $0x48] sm:$0xff] %vm558_vm2, %v636_v33 }
 0x229   : > { %v621_v37 = vpop.xlane.xlu0 %620 }
 0x22a   : > { %659 = vst.msk [vmem:[%s1175_s19 + $0x20] sm:$0xff] %vm558_vm2, %v621_v37  ;;  %v618_v10 = vpop.xlane.xlu1 %617 }
 0x22b   : > { %658 = vst.msk [vmem:[%s1175_s19 + $0x18] sm:$0xff] %vm558_vm2, %v618_v10 }
 0x22d   : > { %v645_v11 = vpop.xlane.xlu0 %644 }
 0x22e   : > { %667 = vst.msk [vmem:[%s1175_s19 + $0x60] sm:$0xff] %vm558_vm2, %v645_v11  ;;  %v642_v12 = vpop.xlane.xlu1 %641 }
 0x22f   : > { %666 = vst.msk [vmem:[%s1175_s19 + $0x58] sm:$0xff] %vm558_vm2, %v642_v12 }
 0x231   : > { %v627_v13 = vpop.xlane.xlu0 %626 }
 0x232   : > { %661 = vst.msk [vmem:[%s1175_s19 + $0x30] sm:$0xff] %vm558_vm2, %v627_v13  ;;  %v624_v14 = vpop.xlane.xlu1 %623 }
 0x233   : > { %660 = vst.msk [vmem:[%s1175_s19 + $0x28] sm:$0xff] %vm558_vm2, %v624_v14 }
 0x235   : > { %v651_v15 = vpop.xlane.xlu0 %650 }
 0x236   : > { %669 = vst.msk [vmem:[%s1175_s19 + $0x70] sm:$0xff] %vm558_vm2, %v651_v15  ;;  %v648_v16 = vpop.xlane.xlu1 %647 }
 0x237   : > { %668 = vst.msk [vmem:[%s1175_s19 + $0x68] sm:$0xff] %vm558_vm2, %v648_v16 }
 0x23a   : > { %v630_v17 = vpop.xlane.xlu1 %629 }
 0x23b   : > { %662 = vst.msk [vmem:[%s1175_s19 + $0x38] sm:$0xff] %vm558_vm2, %v630_v17 }
 0x23e   : > { %v654_v19 = vpop.xlane.xlu1 %653 }
 0x23f   : > { %670 = vst.msk [vmem:[%s1175_s19 + $0x78] sm:$0xff] %vm558_vm2, %v654_v19 }
 0x240 PF: > { %s14_s14 = sadd.s32 1, %s923_s14   ;;  %s1222_s12 = smov %s919_s13 }
 0x241   : > { %p11_p5 = scmp.ge.s32.totalorder %s14_s14, 4   ;;  %s1223_s13 = smov %s1225_s15 }
 0x243   :  { %13 = sbr.rel (!%p11_p5) target bundleno = 2 (0x2), region = 70 }

</bundles_post_ra>
